<compile_context>
chip_gen: v6e
topology: v6e:2x2x1
jax: 0.10.0
libtpu: 0.0.40
codegen_flags: <defaults>
</compile_context>

<pallas_src>
import jax
import jax.numpy as jnp
from jax import lax
from jax.experimental import pallas as pl
from jax.experimental.pallas import tpu as pltpu


def _cdiv(a: int, b: int) -> int:
    return -(-a // b)


def _round_up(x: int, m: int) -> int:
    return _cdiv(x, m) * m


def _choose_tiles(batch: int, tb_max: int):
    """Pick (tile_batch, padded_batch, n_tiles): balanced, 128-lane aligned."""
    LANE = 128
    b_lanes = _round_up(max(batch, 1), LANE)
    n_tiles = _cdiv(b_lanes, tb_max)
    # Prefer >= 2 balanced tiles when there is enough work, so v7x's two
    # TensorCores each get a "parallel" grid step (near-free on v5e/v6e).
    if n_tiles == 1 and b_lanes >= 2 * LANE:
        n_tiles = 2
    tb = _round_up(_cdiv(b_lanes, n_tiles), LANE)
    return tb, n_tiles * tb, n_tiles


def mlp_kernel(x_ref, w1_ref, b1_ref, w2_ref, b2_ref, outT_ref):
    # x_ref   : (tb, input_size)      bf16   -- native torch layout (batch-major)
    # w1_ref  : (hidden, input_size)  bf16   -- torch fc1.weight layout
    # b1_ref  : (hidden, 1)           f32
    # w2_ref  : (nb_action, hidden)   bf16   -- torch fc2.weight layout
    # b2_ref  : (nb_action, 1)        f32
    # outT_ref: (nb_action, tb)       f32    -- batch on lanes => lane-dense stores
    x = x_ref[...]
    # h[h, b] = sum_k W1[h, k] * x[b, k]   (re-orientation happens on the MXU/XLU,
    # not via an HBM round trip in the wrapper)
    h = lax.dot_general(w1_ref[...], x, (((1,), (1,)), ((), ())),
                        preferred_element_type=jnp.float32)
    h = jnp.maximum(h + b1_ref[...], 0.0)                      # (hidden, tb) f32
    q = jnp.dot(w2_ref[...], h.astype(w2_ref.dtype),
                preferred_element_type=jnp.float32) + b2_ref[...]
    outT_ref[...] = q.astype(outT_ref.dtype)                   # (nb_action, tb)


def network_forward(state, w1, b1, w2, b2, *, tb_max=8192):
    """Forward pass of Network.

    state : (B, input_size) float32
    w1    : (hidden, input_size) float32   (torch fc1.weight, NOT transposed)
    b1    : (hidden,) float32
    w2    : (nb_action, hidden) float32    (torch fc2.weight)
    b2    : (nb_action,) float32
    returns (B, nb_action) float32
    """
    B, input_size = state.shape
    hidden = w1.shape[0]
    nb_action = w2.shape[0]

    tb, B_pad, n_tiles = _choose_tiles(B, tb_max)

    # Native layout; only pad the batch axis (<= ~128 extra rows per tile).
    x = state.astype(jnp.bfloat16)
    if B_pad != B:
        x = jnp.pad(x, ((0, B_pad - B), (0, 0)))

    w1b = w1.astype(jnp.bfloat16)
    w2b = w2.astype(jnp.bfloat16)
    b1c = b1.astype(jnp.float32).reshape(hidden, 1)
    b2c = b2.astype(jnp.float32).reshape(nb_action, 1)

    flops = 2 * B_pad * (hidden * input_size + nb_action * hidden)
    bytes_accessed = (B_pad * input_size * 2            # x (bf16)
                      + B_pad * nb_action * 4           # output (f32)
                      + hidden * input_size * 2 + nb_action * hidden * 2
                      + (hidden + nb_action) * 4)

    outT = pl.pallas_call(
        mlp_kernel,
        out_shape=jax.ShapeDtypeStruct((nb_action, B_pad), jnp.float32),
        grid=(n_tiles,),
        in_specs=[
            # Activations: tiled along the batch (sublane) axis, native layout.
            pl.BlockSpec((tb, input_size), lambda i: (i, 0)),
            # Weights / biases: constant block index -> resident in VMEM.
            pl.BlockSpec((hidden, input_size), lambda i: (0, 0)),
            pl.BlockSpec((hidden, 1), lambda i: (0, 0)),
            pl.BlockSpec((nb_action, hidden), lambda i: (0, 0)),
            pl.BlockSpec((nb_action, 1), lambda i: (0, 0)),
        ],
        # Output keeps batch on lanes -> wide unmasked vst.
        out_specs=pl.BlockSpec((nb_action, tb), lambda i: (0, i)),
        compiler_params=pltpu.CompilerParams(
            dimension_semantics=("parallel",),
            allow_input_fusion=[True, True, True, True, True],
        ),
        cost_estimate=pl.CostEstimate(flops=flops, transcendentals=0,
                                      bytes_accessed=bytes_accessed),
    )(x, w1b, b1c, w2b, b2c)

    # Tiny (nb_action, B) slice + transpose back to the PyTorch layout.
    return outT[:, :B].T


def init_params(key, input_size, nb_action, hidden=30):
    """PyTorch nn.Linear-style init (uniform +/- 1/sqrt(fan_in)), torch layouts."""
    k1, k2, k3, k4 = jax.random.split(key, 4)
    bound1 = 1.0 / jnp.sqrt(jnp.float32(input_size))
    bound2 = 1.0 / jnp.sqrt(jnp.float32(hidden))
    w1 = jax.random.uniform(k1, (hidden, input_size), jnp.float32, -bound1, bound1)
    b1 = jax.random.uniform(k2, (hidden,), jnp.float32, -bound1, bound1)
    w2 = jax.random.uniform(k3, (nb_action, hidden), jnp.float32, -bound2, bound2)
    b2 = jax.random.uniform(k4, (nb_action,), jnp.float32, -bound2, bound2)
    return w1, b1, w2, b2


def _reference(state, w1, b1, w2, b2):
    h = jnp.maximum(state @ w1.T + b1, 0.0)
    return h @ w2.T + b2


if __name__ == "__main__":
    key = jax.random.PRNGKey(0)
    input_size = 5     # state dimension
    nb_action = 3

    k_state, k_params, k_big = jax.random.split(key, 3)
    w1, b1, w2, b2 = init_params(k_params, input_size, nb_action)

    fwd = jax.jit(network_forward)

    # Small batch (matches the original usage; bf16 activations => loose tol).
    batch = 2
    state = jax.random.normal(k_state, (batch, input_size), jnp.float32)
    q_values = jax.block_until_ready(fwd(state, w1, b1, w2, b2))
    q_ref = _reference(state, w1, b1, w2, b2)
    assert q_values.shape == (batch, nb_action)
    assert jnp.allclose(q_values, q_ref, atol=5e-2, rtol=5e-2)

    # Larger batch: exercises the 2-tile "parallel" grid with zero batch padding.
    big_batch = 1536  # -> tb=768, B_pad=1536, grid=(2,)
    state_big = jax.random.normal(k_big, (big_batch, input_size), jnp.float32)
    q_big = jax.block_until_ready(fwd(state_big, w1, b1, w2, b2))
    q_big_ref = _reference(state_big, w1, b1, w2, b2)
    assert q_big.shape == (big_batch, nb_action)
    assert jnp.allclose(q_big, q_big_ref, atol=5e-2, rtol=5e-2)

    print("KERNEL_OK")
</pallas_src>

<mosaic_0001>
module attributes {stable_mosaic.version = 11 : i64} {
  func.func @mlp_kernel(%arg0: i32, %arg1: memref<128x5xbf16, #tpu.memory_space<vmem>>, %arg2: memref<30x5xbf16, #tpu.memory_space<vmem>>, %arg3: memref<30x1xf32, #tpu.memory_space<vmem>>, %arg4: memref<3x30xbf16, #tpu.memory_space<vmem>>, %arg5: memref<3x1xf32, #tpu.memory_space<vmem>>, %arg6: memref<3x128xf32, #tpu.memory_space<vmem>>) attributes {dimension_semantics = [#tpu.dimension_semantics<parallel>], iteration_bounds = array<i64: 1>, scalar_prefetch = 0 : i64, scratch_operands = 0 : i64, tpu.core_type = #tpu.core_type<tc>, window_params = [{transform_indices = @transform_0, window_bounds = array<i64: 128, 5>}, {pipeline_mode = #tpu.pipeline_mode<synchronous>, transform_indices = @transform_1, window_bounds = array<i64: 30, 5>}, {pipeline_mode = #tpu.pipeline_mode<synchronous>, transform_indices = @transform_2, window_bounds = array<i64: 30, 1>}, {pipeline_mode = #tpu.pipeline_mode<synchronous>, transform_indices = @transform_3, window_bounds = array<i64: 3, 30>}, {pipeline_mode = #tpu.pipeline_mode<synchronous>, transform_indices = @transform_4, window_bounds = array<i64: 3, 1>}, {transform_indices = @transform_5, window_bounds = array<i64: 3, 128>}]} {
    %c0 = arith.constant 0 : index
    %c0_0 = arith.constant 0 : index
    %0 = vector.load %arg1[%c0, %c0_0] : memref<128x5xbf16, #tpu.memory_space<vmem>>, vector<128x5xbf16>
    %c0_1 = arith.constant 0 : index
    %c0_2 = arith.constant 0 : index
    %1 = vector.load %arg2[%c0_1, %c0_2] : memref<30x5xbf16, #tpu.memory_space<vmem>>, vector<30x5xbf16>
    %cst = arith.constant dense<0.000000e+00> : vector<30x128xf32>
    %2 = tpu.matmul %1, %0, %cst {dimension_numbers = #tpu.dot_dimension_numbers<[1], [1], [0], [0], [0, 0, 1, 0], [], []>} : vector<30x5xbf16>, vector<128x5xbf16>, vector<30x128xf32> -> vector<30x128xf32>
    %c0_3 = arith.constant 0 : index
    %c0_4 = arith.constant 0 : index
    %3 = vector.load %arg3[%c0_3, %c0_4] : memref<30x1xf32, #tpu.memory_space<vmem>>, vector<30x1xf32>
    %4 = vector.broadcast %3 : vector<30x1xf32> to vector<30x128xf32>
    %5 = arith.addf %2, %4 : vector<30x128xf32>
    %cst_5 = arith.constant 0.000000e+00 : f32
    %6 = vector.broadcast %cst_5 : f32 to vector<30x128xf32>
    %7 = arith.maximumf %5, %6 : vector<30x128xf32>
    %c0_6 = arith.constant 0 : index
    %c0_7 = arith.constant 0 : index
    %8 = vector.load %arg4[%c0_6, %c0_7] : memref<3x30xbf16, #tpu.memory_space<vmem>>, vector<3x30xbf16>
    %9 = arith.truncf %7 : vector<30x128xf32> to vector<30x128xbf16>
    %cst_8 = arith.constant dense<0.000000e+00> : vector<3x128xf32>
    %10 = tpu.matmul %8, %9, %cst_8 {dimension_numbers = #tpu.dot_dimension_numbers<[1], [0], [0], [1], [0, 0, 1, 1], [], []>} : vector<3x30xbf16>, vector<30x128xbf16>, vector<3x128xf32> -> vector<3x128xf32>
    %c0_9 = arith.constant 0 : index
    %c0_10 = arith.constant 0 : index
    %11 = vector.load %arg5[%c0_9, %c0_10] : memref<3x1xf32, #tpu.memory_space<vmem>>, vector<3x1xf32>
    %12 = vector.broadcast %11 : vector<3x1xf32> to vector<3x128xf32>
    %13 = arith.addf %10, %12 : vector<3x128xf32>
    %c0_11 = arith.constant 0 : index
    %c0_12 = arith.constant 0 : index
    %14 = vector.load %arg6[%c0_11, %c0_12] : memref<3x128xf32, #tpu.memory_space<vmem>>, vector<3x128xf32>
    tpu.vector_store %arg6[%c0_11, %c0_12], %13 {strides = array<i32>} : memref<3x128xf32, #tpu.memory_space<vmem>>, vector<3x128xf32>,
    return
  }
  func.func @transform_0(%arg0: i32) -> (i32, i32) {
    %c0_i32 = arith.constant 0 : i32
    %c0_i32_0 = arith.constant 0 : i32
    return %arg0, %c0_i32 : i32, i32
  }
  func.func @transform_1(%arg0: i32) -> (i32, i32) {
    %c0_i32 = arith.constant 0 : i32
    %c0_i32_0 = arith.constant 0 : i32
    %c0_i32_1 = arith.constant 0 : i32
    return %c0_i32, %c0_i32_0 : i32, i32
  }
  func.func @transform_2(%arg0: i32) -> (i32, i32) {
    %c0_i32 = arith.constant 0 : i32
    %c0_i32_0 = arith.constant 0 : i32
    %c0_i32_1 = arith.constant 0 : i32
    return %c0_i32, %c0_i32_0 : i32, i32
  }
  func.func @transform_3(%arg0: i32) -> (i32, i32) {
    %c0_i32 = arith.constant 0 : i32
    %c0_i32_0 = arith.constant 0 : i32
    %c0_i32_1 = arith.constant 0 : i32
    return %c0_i32, %c0_i32_0 : i32, i32
  }
  func.func @transform_4(%arg0: i32) -> (i32, i32) {
    %c0_i32 = arith.constant 0 : i32
    %c0_i32_0 = arith.constant 0 : i32
    %c0_i32_1 = arith.constant 0 : i32
    return %c0_i32, %c0_i32_0 : i32, i32
  }
  func.func @transform_5(%arg0: i32) -> (i32, i32) {
    %c0_i32 = arith.constant 0 : i32
    %c0_i32_0 = arith.constant 0 : i32
    return %c0_i32, %arg0 : i32, i32
  }
}

</mosaic_0001>

<bundles_post_ra>
// kernel: network_forward.2
= control target key start
LH: loop header
LB: loop body
LE: loop exit
PB: predicated region body
PF: predicated region fallthrough
CT: control target
= control target key end

     0   :  { %s576_s0 = inlined_call_operand.vmem [shape: bf16[30,5], index: 0, kind: input, shape index: {}]   ;;  %s577_s1 = inlined_call_operand.vmem [shape: f32[30,1], index: 1, kind: input, shape index: {}]   ;;  %s578_s2 = inlined_call_operand.vmem [shape: f32[3,1], index: 2, kind: input, shape index: {}]   ;;  %s579_s3 = inlined_call_operand.vmem [shape: bf16[2,5], index: 3, kind: input, shape index: {}]   ;;  %s580_s4 = inlined_call_operand.<no memory space> [shape: bf16[], index: 4, kind: input, shape index: {}]   ;;  %s581_s5 = inlined_call_operand.vmem [shape: f32[3,30], index: 5, kind: input, shape index: {}]   ;;  %s582_s6 = inlined_call_operand.vmem [shape: f32[3,128], index: 6, kind: output, shape index: {}]  }
   0x1   :  { %v11_v0 = vstv %s580_s4 }
   0x2   :  { %v12_v1 = vunpack.i.l.bf16 %v11_v0 }
   0x3   :  { %vm224_vm0 = vcmask 39936   ;;  %v29_v3 = vld [vmem:[%s579_s3] sm:$0x1]  ;;  %v32_v4 = vlaneseq  ;;  %v152_v9 = vld [vmem:[%s577_s1 + $0x10] sm:$0xff]  ;;  %v487_v10 = vmov 0   ;;  %v151_v14 = vld [vmem:[%s577_s1 + $0x8] sm:$0xff] }
   0x4   :  { %v391_v2 = vpack.c.bf16 %v12_v1, %v12_v1  ;;  %v485_v5 = vld [vmem:[%s576_s0] sm:$0xff]   ;;  %v30_v6 = vunpack.c.l.bf16 %v29_v3  ;;  %475 = vset.pattern.permute.xlu0 %v487_v10  ;;  %476 = vset.pattern.permute.xlu1 %v487_v10  ;;  %v153_v13 = vld [vmem:[%s577_s1 + $0x18] sm:$0x3f]  ;;  %v486_v34 = vld [vmem:[%s576_s0 + $0x8] sm:$0x7f]   ;;  %v488_v36 = vmov 0.0  }
   0x5   :  { %v33_v7 = vshrl.u32 %v32_v4, 7  ;;  %v38_v8 = vand.u32 127, %v32_v4  ;;  %452 = vmatprep.mubr.msk.bf16.mxu0 %vm224_vm0, %v485_v5  ;;  %v150_v11 = vld [vmem:[%s577_s1] sm:$0xff]  ;;  %166 = vperm.xlu0 %475, %v152_v9   ;;  %vm489_vm3 = vmmov 0   ;;  %vm321_vm4 = vcmask 1046528  }
   0x6   :  { %422 = vst [vmem:[#allocation7 + $0x38] sm:$0xff] %v391_v2   ;;  %392 = vst [vmem:[#allocation7 + $0x8] sm:$0xff] %v391_v2   ;;  %156 = vperm.xlu1 %476, %v150_v11   ;;  %v311_v17 = vld [vmem:[%s578_s2] sm:$0x7]  ;;  %456 = vmatprep.subr.bf16.mxu1 %v488_v36  ;;  %vm317_vm5 = vcmask 244736  }
   0x7   :  { %397 = vst [vmem:[#allocation7 + $0x10] sm:$0xff] %v391_v2   ;;  %402 = vst [vmem:[#allocation7 + $0x18] sm:$0xff] %v391_v2   ;;  %vm35_vm1 = vcmp.lt.s32.totalorder %v33_v7, 2  ;;  %vm40_vm2 = vcmp.lt.s32.totalorder %v38_v8, 5  ;;  %v121_v35 = vld [vmem:[%s581_s5] sm:$0x7]  ;;  %460 = vmatprep.mubr.msk.bf16.mxu1 %vm489_vm3, %v488_v36 }
   0x8   :  { %407 = vst [vmem:[#allocation7 + $0x20] sm:$0xff] %v391_v2   ;;  %412 = vst [vmem:[#allocation7 + $0x28] sm:$0xff] %v391_v2   ;;  %v36_v12 = vsel %vm35_vm1, %v30_v6, %v12_v1  ;;  %v125_v37 = vpack.c.bf16 %v488_v36, %v121_v35 }
   0x9   :  { %417 = vst [vmem:[#allocation7 + $0x30] sm:$0xff] %v391_v2   ;;  %v41_v15 = vsel %vm40_vm2, %v36_v12, %v12_v1  ;;  %171 = vperm.xlu0 %475, %v153_v13  }
   0xa   :  { %v386_v16 = vpack.c.bf16 %v12_v1, %v41_v15  ;;  %161 = vperm.xlu1 %476, %v151_v14   ;;  %128 = vst [vmem:[#allocation8] sm:$0x3] %v125_v37 }
   0xc   :  { %387 = vst [vmem:[#allocation7] sm:$0xff] %v386_v16  }
   0xd   :  { %v477_v18 = vld [vmem:[#allocation7 + $0x38] sm:$0xff]   ;;  %314 = vperm.xlu0 %475, %v311_v17   ;;  %v483_v30 = vld [vmem:[#allocation7 + $0x8] sm:$0xff]  }
   0xe   :  { %464 = vmatprep.subr.msk.bf16.mxu0 %vm224_vm0, %v477_v18  ;;  %v253_v20 = vsel %vm224_vm0, %v477_v18, 0  ;;  %v481_v26 = vld [vmem:[#allocation7 + $0x18] sm:$0xff]   ;;  %v482_v28 = vld [vmem:[#allocation7 + $0x10] sm:$0xff]   ;;  %v235_v31 = vsel %vm224_vm0, %v483_v30, 0 }
   0xf   :  { %437 = vmatpush3.bf16.xpose.msra.mxu0 %v253_v20  ;;  %v479_v22 = vld [vmem:[#allocation7 + $0x28] sm:$0xff]   ;;  %v480_v24 = vld [vmem:[#allocation7 + $0x20] sm:$0xff]   ;;  %v241_v27 = vsel %vm224_vm0, %v481_v26, 0  ;;  %v238_v29 = vsel %vm224_vm0, %v482_v28, 0 }
  0x10   :  { %v478_v19 = vld [vmem:[#allocation7 + $0x30] sm:$0xff]   ;;  %v247_v23 = vsel %vm224_vm0, %v479_v22, 0  ;;  %v244_v25 = vsel %vm224_vm0, %v480_v24, 0 }
  0x11   :  { %465 = vmatprep.subr.msk.bf16.mxu0 %vm224_vm0, %v478_v19  ;;  %v250_v21 = vsel %vm224_vm0, %v478_v19, 0  ;;  %v308_v57 = vld [vmem:[#allocation8] sm:$0x3] }
  0x13   :  { %v484_v32 = vld [vmem:[#allocation7] sm:$0xff]  }
  0x14   :  { %v232_v33 = vsel %vm224_vm0, %v484_v32, 0 }
  0x17   :  { %439 = vmatpush3.bf16.xpose.msra.mxu0 %v250_v21 }
  0x18   :  { %466 = vmatprep.subr.msk.bf16.mxu0 %vm224_vm0, %v479_v22 }
  0x1f   :  { %441 = vmatpush3.bf16.xpose.msra.mxu0 %v247_v23 }
  0x20   :  { %467 = vmatprep.subr.msk.bf16.mxu0 %vm224_vm0, %v480_v24 }
  0x27   :  { %443 = vmatpush3.bf16.xpose.msra.mxu0 %v244_v25 }
  0x28   :  { %468 = vmatprep.subr.msk.bf16.mxu0 %vm224_vm0, %v481_v26 }
  0x2f   :  { %445 = vmatpush3.bf16.xpose.msra.mxu0 %v241_v27 }
  0x30   :  { %469 = vmatprep.subr.msk.bf16.mxu0 %vm224_vm0, %v482_v28 }
  0x37   :  { %447 = vmatpush3.bf16.xpose.msra.mxu0 %v238_v29 }
  0x38   :  { %470 = vmatprep.subr.msk.bf16.mxu0 %vm224_vm0, %v483_v30 }
  0x3f   :  { %449 = vmatpush3.bf16.xpose.msra.mxu0 %v235_v31 }
  0x40   :  { %471 = vmatprep.subr.msk.bf16.mxu0 %vm224_vm0, %v484_v32 }
  0x47   :  { %451 = vmatpush3.bf16.xpose.msra.mxu0 %v232_v33 }
  0x4e   :  { %453 = vmatmul.mubr.msk.bf16.vlgmr.msra.gmra.mxu0 %vm224_vm0, %v486_v34 }
  0x80   :  { %v167_v38 = vpop.permute.xlu0 %166 }
  0x81   :  { %v157_v39 = vpop.permute.xlu1 %156 }
  0x84   :  { %v172_v42 = vpop.permute.xlu0 %171 }
  0x85   :  { %v162_v45 = vpop.permute.xlu1 %161 }
  0x88   :  { %v315_v58 = vpop.permute.xlu0 %314 }
 0x10e   :  { %v454_v40 = vpop.f32.mrf.mxu0 }
 0x10f   :  { %v298_v43 = vadd.f32 %v454_v40, %v167_v38 }
 0x110   :  { %v289_v41 = vpop.f32.mrf.mxu0 }
 0x111   :  { %v306_v48 = vmax.f32 %v298_v43, 0.0  ;;  %v290_v51 = vadd.f32 %v289_v41, %v157_v39 }
 0x112   :  { %v455_v44 = vpop.f32.mrf.mxu0 }
 0x113   :  { %v301_v46 = vadd.f32 %v455_v44, %v172_v42  ;;  %v304_v55 = vmax.f32 %v290_v51, 0.0 }
 0x114   :  { %v292_v47 = vpop.f32.mrf.mxu0 }
 0x115   :  { %v307_v49 = vmax.f32 %v301_v46, 0.0  ;;  %v293_v50 = vadd.f32 %v292_v47, %v162_v45 }
 0x117   :  { %v310_v52 = vpack.c.bf16 %v307_v49, %v306_v48  ;;  %v305_v53 = vmax.f32 %v293_v50, 0.0 }
 0x119   :  { %v323_v54 = vsel %vm321_vm4, %v310_v52, 0  ;;  %v309_v56 = vpack.c.bf16 %v305_v53, %v304_v55 }
 0x11a   :  { %457 = vmatpush3.bf16.msra.mxu1 %v323_v54 }
 0x11b   :  { %458 = vmatprep.subr.bf16.mxu1 %v488_v36 }
 0x11e   :  { %459 = vmatpush3.bf16.msra.mxu1 %v309_v56 }
 0x121   :  { %461 = vmatmul.mubr.msk.bf16.vlgmr.msra.gmra.mxu1 %vm317_vm5, %v308_v57 }
 0x1e1   :  { %v359_v59 = vpop.f32.mrf.mxu1 }
 0x1e2   :  { %v360_v60 = vadd.f32 %v359_v59, %v315_v58 }
 0x1e3   :  { %v462_v61 = vpop.f32.mrf.mxu1 }
 0x1e4   :  { %365 = vst [vmem:[%s582_s6] sm:$0x7] %v360_v60 }
 0x1e5   :  { %v362_v62 = vpop.f32.mrf.mxu1 }
 0x1e7   :  { %v463_v63 = vpop.f32.mrf.mxu1 }

</bundles_post_ra>
